<compile_context>
chip_gen: v6e
topology: v6e:2x2x1
jax: 0.10.0
libtpu: 0.0.40
codegen_flags: <defaults>
</compile_context>

<pallas_src>
import functools

import jax
import jax.numpy as jnp
from jax.experimental import pallas as pl
from jax.experimental.pallas import tpu as pltpu


def _round_up(a, b):
    return ((a + b - 1) // b) * b


def _pick_tile(n_pad, desired, min_tiles=1):
    """Largest multiple-of-128 tile that divides n_pad, is <= desired and
    (when possible) leaves at least `min_tiles` tiles along that axis."""
    m = n_pad // 128
    best = 128
    for d in range(1, m + 1):
        if m % d:
            continue
        t = 128 * d
        if t <= max(desired, 128) and (n_pad // t) >= min_tiles:
            best = t
    return best


def _pad_cast_2d(a, rows, cols, dtype):
    """Zero-pad + cast, skipping the copy when already aligned & right dtype."""
    r, c = a.shape
    if (r, c) == (rows, cols):
        return a if a.dtype == dtype else a.astype(dtype)
    return jnp.zeros((rows, cols), dtype).at[:r, :c].set(a.astype(dtype))


def _vmem_capacity_bytes():
    """Physical VMEM per TensorCore; conservative fallback = v7x's 64 MiB."""
    try:
        cap = getattr(pltpu.get_tpu_info(), "vmem_capacity_bytes", None)
        if cap:
            return int(cap)
    except Exception:
        pass
    return 64 * 1024 * 1024


def _epilogue(mixed_f32, w_ref, b_ref, o_ref):
    # MXU matmul #2: linear layer (bf16 operands, f32 accumulate) + bias + ReLU.
    y = jnp.dot(mixed_f32.astype(w_ref.dtype), w_ref[...],
                preferred_element_type=jnp.float32)
    y = y + b_ref[...]
    o_ref[...] = jnp.maximum(y, 0.0).astype(o_ref.dtype)


def _gcn_kernel_resident(adj_ref, x_ref, w_ref, b_ref, o_ref, acc_ref, *,
                         alpha, tm, tk):
    """x is fully resident in VMEM; slice both the reduction chunk and the
    alpha-mix row chunk out of the same copy."""
    i = pl.program_id(0)
    k = pl.program_id(1)

    @pl.when(k == 0)
    def _():
        acc_ref[...] = jnp.zeros_like(acc_ref)

    # MXU matmul #1: neighborhood propagation (bf16 operands, f32 accumulate).
    k_off = pl.multiple_of(k * tk, tk)
    acc_ref[...] += jnp.dot(adj_ref[...], x_ref[pl.ds(k_off, tk), :],
                            preferred_element_type=jnp.float32)

    @pl.when(k == pl.num_programs(1) - 1)
    def _():
        i_off = pl.multiple_of(i * tm, tm)
        x_row = x_ref[pl.ds(i_off, tm), :].astype(jnp.float32)
        mixed = alpha * x_row + (1.0 - alpha) * acc_ref[...]
        _epilogue(mixed, w_ref, b_ref, o_ref)


def _gcn_kernel_streamed(adj_ref, xr_ref, xm_ref, w_ref, b_ref, o_ref, acc_ref,
                         *, alpha):
    """Fallback when x does not fit VMEM: x streamed twice (both bf16)."""
    k = pl.program_id(1)

    @pl.when(k == 0)
    def _():
        acc_ref[...] = jnp.zeros_like(acc_ref)

    acc_ref[...] += jnp.dot(adj_ref[...], xr_ref[...],
                            preferred_element_type=jnp.float32)

    @pl.when(k == pl.num_programs(1) - 1)
    def _():
        mixed = (alpha * xm_ref[...].astype(jnp.float32)
                 + (1.0 - alpha) * acc_ref[...])
        _epilogue(mixed, w_ref, b_ref, o_ref)


def gcn_layer(x, adj, weight, bias, alpha=0.1, *,
              tm=512, tk=1024,
              compute_dtype=jnp.bfloat16,
              out_dtype=None,
              x_resident=None,
              vmem_limit_bytes=None):
    """x: [N, Fin], adj: [N, N], weight: [Fin, Fout], bias: [Fout] -> [N, Fout].

    Computes relu((alpha*x + (1-alpha)*(adj@x)) @ weight + bias).
    """
    N, Fin = x.shape
    Fout = weight.shape[1]
    out_dtype = x.dtype if out_dtype is None else out_dtype

    # Lane-dense padding of the feature dims, 128-padding of N (zeros keep the
    # math exact; padding is sliced off at the end).
    fin_p = _round_up(Fin, 128)
    fout_p = _round_up(Fout, 128)
    n_p = _round_up(N, 128)

    cdt = jnp.dtype(compute_dtype).itemsize
    odt = jnp.dtype(out_dtype).itemsize

    # Per-chip VMEM budget (v7x ~56 MiB per TC, v5e/v6e ~112 MiB).
    if vmem_limit_bytes is None:
        vmem_limit_bytes = (_vmem_capacity_bytes() * 7) // 8
    budget = int(vmem_limit_bytes)

    # Double-buffered working-set estimate (conservative: 2 bufs everywhere).
    fixed = 2 * fin_p * fout_p * cdt + 2 * fout_p * 4   # weight + bias

    def working_set(tm_, tk_, resident):
        ws = fixed
        ws += 2 * tm_ * tk_ * cdt            # adj tiles (the O(N^2) stream)
        ws += tm_ * fin_p * 4                # f32 accumulator scratch
        ws += 2 * tm_ * fout_p * odt         # output tiles
        if resident:
            ws += 2 * n_p * fin_p * cdt      # x, resident across the grid
        else:
            ws += 2 * tk_ * fin_p * cdt      # x reduction-row tiles
            ws += 2 * tm_ * fin_p * cdt      # x output-row tiles (bf16)
        return ws

    # Tile selection: divide padded N exactly, >=2 row tiles when possible
    # (2 TensorCores on v7x), auto-shrink until the working set fits.
    want_tm, want_tk = tm, tk
    min_row_tiles = 2 if n_p >= 256 else 1
    while True:
        tm_eff = _pick_tile(n_p, want_tm, min_tiles=min_row_tiles)
        tk_eff = _pick_tile(n_p, want_tk)
        if (working_set(tm_eff, tk_eff, False) <= budget
                or (tm_eff == 128 and tk_eff == 128)):
            break
        if want_tk > 128:
            want_tk //= 2
        else:
            want_tm //= 2
    tm, tk = tm_eff, tk_eff

    if x_resident is None:
        x_resident = working_set(tm, tk, True) <= budget

    # Padded / cast operands (copy skipped when already aligned & bf16).
    adj_p = _pad_cast_2d(adj, n_p, n_p, compute_dtype)
    x_p = _pad_cast_2d(x, n_p, fin_p, compute_dtype)
    w_p = _pad_cast_2d(weight, fin_p, fout_p, compute_dtype)
    b_p = jnp.zeros((1, fout_p), jnp.float32).at[0, :Fout].set(
        bias.astype(jnp.float32))

    grid = (n_p // tm, n_p // tk)

    adj_spec = pl.BlockSpec((tm, tk), lambda i, k: (i, k))
    w_spec = pl.BlockSpec((fin_p, fout_p), lambda i, k: (0, 0))
    b_spec = pl.BlockSpec((1, fout_p), lambda i, k: (0, 0))
    out_spec = pl.BlockSpec((tm, fout_p), lambda i, k: (i, 0))

    cost = pl.CostEstimate(
        flops=2 * n_p * n_p * fin_p + 2 * n_p * fin_p * fout_p,
        transcendentals=0,
        bytes_accessed=(n_p * n_p * cdt + n_p * fin_p * cdt
                        + fin_p * fout_p * cdt + n_p * fout_p * odt))

    common = dict(
        out_shape=jax.ShapeDtypeStruct((n_p, fout_p), out_dtype),
        grid=grid,
        out_specs=out_spec,
        scratch_shapes=[pltpu.VMEM((tm, fin_p), jnp.float32)],
        compiler_params=pltpu.CompilerParams(
            dimension_semantics=("parallel", "arbitrary"),
            vmem_limit_bytes=budget),
        cost_estimate=cost,
    )

    if x_resident:
        kernel = functools.partial(_gcn_kernel_resident,
                                   alpha=float(alpha), tm=tm, tk=tk)
        out_p = pl.pallas_call(
            kernel,
            in_specs=[adj_spec,
                      pl.BlockSpec((n_p, fin_p), lambda i, k: (0, 0)),
                      w_spec, b_spec],
            **common,
        )(adj_p, x_p, w_p, b_p)
    else:
        kernel = functools.partial(_gcn_kernel_streamed, alpha=float(alpha))
        out_p = pl.pallas_call(
            kernel,
            in_specs=[adj_spec,
                      pl.BlockSpec((tk, fin_p), lambda i, k: (k, 0)),
                      pl.BlockSpec((tm, fin_p), lambda i, k: (i, 0)),
                      w_spec, b_spec],
            **common,
        )(adj_p, x_p, x_p, w_p, b_p)

    # Slice off row / lane padding.
    return out_p[:N, :Fout]


def _reference(x, adj, weight, bias, alpha=0.1):
    prop = adj @ x
    mixed = alpha * x + (1.0 - alpha) * prop
    return jnp.maximum(mixed @ weight + bias[None, :], 0.0)


def _make_inputs(key, n, fin, fout):
    k_x, k_adj, k_w, k_b = jax.random.split(key, 4)
    x = jax.random.normal(k_x, (n, fin), dtype=jnp.float32)
    a = jax.random.uniform(k_adj, (n, n), dtype=jnp.float32)
    adj = (a + a.T) * 0.5
    adj = adj / jnp.sum(adj, axis=1, keepdims=True)
    bound = 1.0 / (fin ** 0.5)
    weight = jax.random.uniform(k_w, (fin, fout), dtype=jnp.float32,
                                minval=-bound, maxval=bound)
    bias = jax.random.uniform(k_b, (fout,), dtype=jnp.float32,
                              minval=-bound, maxval=bound)
    return x, adj, weight, bias


if __name__ == "__main__":
    ALPHA = 0.1
    key = jax.random.PRNGKey(0)
    k1, k2 = jax.random.split(key, 2)

    # --- small shapes consistent with the module: N nodes, Fin/Fout features ---
    N, FIN, FOUT = 8, 32, 16
    x, adj, weight, bias = _make_inputs(k1, N, FIN, FOUT)
    out = jax.block_until_ready(gcn_layer(x, adj, weight, bias, alpha=ALPHA))
    ref = _reference(x, adj, weight, bias, alpha=ALPHA)
    assert out.shape == (N, FOUT)
    # bf16 matmul operands (f32 accumulation) -> bf16-level tolerance.
    assert jnp.allclose(out, ref, atol=2e-2, rtol=2e-2), "mismatch (small)"

    # --- multi-tile: exercises row tiling AND the k-axis accumulator (resident x) ---
    N2 = 320
    x2, adj2, weight2, bias2 = _make_inputs(k2, N2, FIN, FOUT)
    out2 = jax.block_until_ready(
        gcn_layer(x2, adj2, weight2, bias2, alpha=ALPHA, tm=128, tk=128))
    ref2 = _reference(x2, adj2, weight2, bias2, alpha=ALPHA)
    assert out2.shape == (N2, FOUT)
    assert jnp.allclose(out2, ref2, atol=2e-2, rtol=2e-2), "mismatch (tiled)"

    # --- same problem through the streamed-x fallback path (coverage) ---
    out3 = jax.block_until_ready(
        gcn_layer(x2, adj2, weight2, bias2, alpha=ALPHA, tm=128, tk=128,
                  x_resident=False))
    assert jnp.allclose(out3, ref2, atol=2e-2, rtol=2e-2), "mismatch (streamed)"

    print("KERNEL_OK")
</pallas_src>

<mosaic_0001>
module attributes {stable_mosaic.version = 11 : i64} {
  func.func @_gcn_kernel_resident(%arg0: i32, %arg1: i32, %arg2: memref<128x128xbf16, #tpu.memory_space<vmem>>, %arg3: memref<128x128xbf16, #tpu.memory_space<vmem>>, %arg4: memref<128x128xbf16, #tpu.memory_space<vmem>>, %arg5: memref<1x128xf32, #tpu.memory_space<vmem>>, %arg6: memref<128x128xf32, #tpu.memory_space<vmem>>, %arg7: memref<128x128xf32, #tpu.memory_space<vmem>>) attributes {dimension_semantics = [#tpu.dimension_semantics<parallel>, #tpu.dimension_semantics<arbitrary>], iteration_bounds = array<i64: 1, 1>, scalar_prefetch = 0 : i64, scratch_operands = 1 : i64, tpu.core_type = #tpu.core_type<tc>, window_params = [{transform_indices = @transform_0, window_bounds = array<i64: 128, 128>}, {pipeline_mode = #tpu.pipeline_mode<synchronous>, transform_indices = @transform_1, window_bounds = array<i64: 128, 128>}, {pipeline_mode = #tpu.pipeline_mode<synchronous>, transform_indices = @transform_2, window_bounds = array<i64: 128, 128>}, {pipeline_mode = #tpu.pipeline_mode<synchronous>, transform_indices = @transform_3, window_bounds = array<i64: 1, 128>}, {transform_indices = @transform_4, window_bounds = array<i64: 128, 128>}]} {
    %c0_i32 = arith.constant 0 : i32
    %0 = arith.cmpi eq, %arg1, %c0_i32 : i32
    %1 = arith.extui %0 : i1 to i32
    %c0_i32_0 = arith.constant 0 : i32
    %2 = arith.cmpi ne, %1, %c0_i32_0 : i32
    scf.if %2 {
      %cst_9 = arith.constant 0.000000e+00 : f32
      %15 = vector.broadcast %cst_9 : f32 to vector<128x128xf32>
      %c0_10 = arith.constant 0 : index
      %c0_11 = arith.constant 0 : index
      %16 = vector.load %arg7[%c0_10, %c0_11] : memref<128x128xf32, #tpu.memory_space<vmem>>, vector<128x128xf32>
      tpu.vector_store %arg7[%c0_10, %c0_11], %15 {strides = array<i32>} : memref<128x128xf32, #tpu.memory_space<vmem>>, vector<128x128xf32>,
    } else {
    }
    %c128_i32 = arith.constant 128 : i32
    %3 = arith.muli %arg1, %c128_i32 : i32
    %4 = tpu.assume_multiple %3, 128 : i32
    %c0 = arith.constant 0 : index
    %c0_1 = arith.constant 0 : index
    %5 = vector.load %arg7[%c0, %c0_1] : memref<128x128xf32, #tpu.memory_space<vmem>>, vector<128x128xf32>
    %c0_2 = arith.constant 0 : index
    %c0_3 = arith.constant 0 : index
    %6 = vector.load %arg2[%c0_2, %c0_3] : memref<128x128xbf16, #tpu.memory_space<vmem>>, vector<128x128xbf16>
    %7 = arith.index_cast %4 : i32 to index
    %c0_4 = arith.constant 0 : index
    %8 = vector.load %arg3[%7, %c0_4] : memref<128x128xbf16, #tpu.memory_space<vmem>>, vector<128x128xbf16>
    %cst = arith.constant dense<0.000000e+00> : vector<128x128xf32>
    %9 = tpu.matmul %6, %8, %cst {dimension_numbers = #tpu.dot_dimension_numbers<[1], [0], [0], [1], [0, 0, 1, 1], [], []>} : vector<128x128xbf16>, vector<128x128xbf16>, vector<128x128xf32> -> vector<128x128xf32>
    %10 = arith.addf %5, %9 : vector<128x128xf32>
    %c0_5 = arith.constant 0 : index
    %c0_6 = arith.constant 0 : index
    %11 = vector.load %arg7[%c0_5, %c0_6] : memref<128x128xf32, #tpu.memory_space<vmem>>, vector<128x128xf32>
    tpu.vector_store %arg7[%c0_5, %c0_6], %10 {strides = array<i32>} : memref<128x128xf32, #tpu.memory_space<vmem>>, vector<128x128xf32>,
    %c0_i32_7 = arith.constant 0 : i32
    %12 = arith.cmpi eq, %arg1, %c0_i32_7 : i32
    %13 = arith.extui %12 : i1 to i32
    %c0_i32_8 = arith.constant 0 : i32
    %14 = arith.cmpi ne, %13, %c0_i32_8 : i32
    scf.if %14 {
      %c128_i32_9 = arith.constant 128 : i32
      %15 = arith.muli %arg0, %c128_i32_9 : i32
      %16 = tpu.assume_multiple %15, 128 : i32
      %17 = arith.index_cast %16 : i32 to index
      %c0_10 = arith.constant 0 : index
      %18 = vector.load %arg3[%17, %c0_10] : memref<128x128xbf16, #tpu.memory_space<vmem>>, vector<128x128xbf16>
      %19 = arith.extf %18 : vector<128x128xbf16> to vector<128x128xf32>
      %cst_11 = arith.constant 1.000000e-01 : f32
      %20 = vector.broadcast %cst_11 : f32 to vector<128x128xf32>
      %21 = arith.mulf %20, %19 : vector<128x128xf32>
      %c0_12 = arith.constant 0 : index
      %c0_13 = arith.constant 0 : index
      %22 = vector.load %arg7[%c0_12, %c0_13] : memref<128x128xf32, #tpu.memory_space<vmem>>, vector<128x128xf32>
      %cst_14 = arith.constant 0.899999976 : f32
      %23 = vector.broadcast %cst_14 : f32 to vector<128x128xf32>
      %24 = arith.mulf %23, %22 : vector<128x128xf32>
      %25 = arith.addf %21, %24 : vector<128x128xf32>
      %26 = arith.truncf %25 : vector<128x128xf32> to vector<128x128xbf16>
      %c0_15 = arith.constant 0 : index
      %c0_16 = arith.constant 0 : index
      %27 = vector.load %arg4[%c0_15, %c0_16] : memref<128x128xbf16, #tpu.memory_space<vmem>>, vector<128x128xbf16>
      %cst_17 = arith.constant dense<0.000000e+00> : vector<128x128xf32>
      %28 = tpu.matmul %26, %27, %cst_17 {dimension_numbers = #tpu.dot_dimension_numbers<[1], [0], [0], [1], [0, 0, 1, 1], [], []>} : vector<128x128xbf16>, vector<128x128xbf16>, vector<128x128xf32> -> vector<128x128xf32>
      %c0_18 = arith.constant 0 : index
      %c0_19 = arith.constant 0 : index
      %29 = vector.load %arg5[%c0_18, %c0_19] : memref<1x128xf32, #tpu.memory_space<vmem>>, vector<1x128xf32>
      %30 = vector.broadcast %29 : vector<1x128xf32> to vector<128x128xf32>
      %31 = arith.addf %28, %30 : vector<128x128xf32>
      %cst_20 = arith.constant 0.000000e+00 : f32
      %32 = vector.broadcast %cst_20 : f32 to vector<128x128xf32>
      %33 = arith.maximumf %31, %32 : vector<128x128xf32>
      %c0_21 = arith.constant 0 : index
      %c0_22 = arith.constant 0 : index
      %34 = vector.load %arg6[%c0_21, %c0_22] : memref<128x128xf32, #tpu.memory_space<vmem>>, vector<128x128xf32>
      tpu.vector_store %arg6[%c0_21, %c0_22], %33 {strides = array<i32>} : memref<128x128xf32, #tpu.memory_space<vmem>>, vector<128x128xf32>,
    } else {
    }
    return
  }
  func.func @transform_0(%arg0: i32, %arg1: i32) -> (i32, i32) {
    %c0_i32 = arith.constant 0 : i32
    return %arg0, %arg1 : i32, i32
  }
  func.func @transform_1(%arg0: i32, %arg1: i32) -> (i32, i32) {
    %c0_i32 = arith.constant 0 : i32
    %c0_i32_0 = arith.constant 0 : i32
    %c0_i32_1 = arith.constant 0 : i32
    return %c0_i32, %c0_i32_0 : i32, i32
  }
  func.func @transform_2(%arg0: i32, %arg1: i32) -> (i32, i32) {
    %c0_i32 = arith.constant 0 : i32
    %c0_i32_0 = arith.constant 0 : i32
    %c0_i32_1 = arith.constant 0 : i32
    return %c0_i32, %c0_i32_0 : i32, i32
  }
  func.func @transform_3(%arg0: i32, %arg1: i32) -> (i32, i32) {
    %c0_i32 = arith.constant 0 : i32
    %c0_i32_0 = arith.constant 0 : i32
    %c0_i32_1 = arith.constant 0 : i32
    return %c0_i32, %c0_i32_0 : i32, i32
  }
  func.func @transform_4(%arg0: i32, %arg1: i32) -> (i32, i32) {
    %c0_i32 = arith.constant 0 : i32
    %c0_i32_0 = arith.constant 0 : i32
    return %arg0, %c0_i32 : i32, i32
  }
}

</mosaic_0001>

<bundles_post_ra>
// kernel: tpu_custom_call.1
= control target key start
LH: loop header
LB: loop body
LE: loop exit
PB: predicated region body
PF: predicated region fallthrough
CT: control target
= control target key end

     0   :  { %9 = vsyncpa [#allocation4], 0  ;;  %s1036_s0 = inlined_call_operand.hbm [shape: bf16[128,128], index: 0, kind: input, shape index: {}]   ;;  %s1037_s1 = inlined_call_operand.hbm [shape: bf16[128,128], index: 1, kind: input, shape index: {}]   ;;  %s1038_s2 = inlined_call_operand.hbm [shape: bf16[128,128], index: 2, kind: input, shape index: {}]   ;;  %s1039_s3 = inlined_call_operand.vmem [shape: f32[1,128], index: 3, kind: input, shape index: {}]   ;;  %s1040_s4 = inlined_call_operand.hbm [shape: f32[128,128], index: 4, kind: output, shape index: {}]  }
   0x1   :  { %10 = vsyncpa [#allocation7], 0 }
   0x2   :  { %11 = vsyncpa [#allocation5], 0  ;;  %s970_s15 = smov [#allocation6]   ;;  %s971_s17 = smov [#allocation3]  }
   0x3   :  { %s29_s16 = sshll.u32 %s970_s15, 4  ;;  %s17_s18 = sshll.u32 %s971_s17, 4  ;;  %s30_s16 = int_to_ptr.vmem [resolvable:$true] %s29_s16  ;;  %s18_s18 = int_to_ptr.vmem [resolvable:$true] %s17_s18 }
   0x4   :  { %s892_s19 = scalar_lea.vmem %s30_s16, 1024  ;;  %p897_p1 = scmp.lt.s32.totalorder %s30_s16, %s30_s16 }
   0x5   :  { %p893_p0 = scmp.ne.s32.totalorder %s30_s16, %s892_s19  ;;  %p898_p2 = scmp.lt.s32.totalorder %s892_s19, %s892_s19 }
   0x7   :  { %p899_p3 = por %p898_p2, %p897_p1 }
   0x9   :  { %p900_p4 = pnand %p899_p3, %p893_p0 }
   0xb   :  { %903 = shalt.err (!%p900_p4)
}
   0xc   :  { %s972_s20 = smov 64   ;;  %s973_s21 = smov 4  }
   0xd   :  { %35 = dma.hbm_to_vmem [thread:$0]  %s1037_s1, 1024, %s30_s16, [#allocation7], %s972_s20, %s972_s20, %s973_s21  }
   0xe   :  { %s912_s24 = scalar_lea.vmem %s18_s18, 1024  ;;  %p917_p6 = scmp.lt.s32.totalorder %s18_s18, %s18_s18 }
   0xf   :  { %p913_p5 = scmp.ne.s32.totalorder %s18_s18, %s912_s24  ;;  %p918_p7 = scmp.lt.s32.totalorder %s912_s24, %s912_s24 }
  0x11   :  { %p919_p8 = por %p918_p7, %p917_p6 }
  0x13   :  { %p920_p9 = pnand %p919_p8, %p913_p5 }
  0x15   :  { %923 = shalt.err (!%p920_p9)
}
  0x16   :  { %23 = dma.hbm_to_vmem [thread:$0]  %s1036_s0, 1024, %s18_s18, [#allocation4], %s972_s20, %s972_s20, %s973_s21  }
  0x17   :  { %s974_s27 = smov [#allocation8]  }
  0x18   :  { %s41_s28 = sshll.u32 %s974_s27, 4  ;;  %s42_s28 = int_to_ptr.vmem [resolvable:$true] %s41_s28 }
  0x19   :  { %s932_s29 = scalar_lea.vmem %s42_s28, 1024  ;;  %p937_p11 = scmp.lt.s32.totalorder %s42_s28, %s42_s28 }
  0x1a   :  { %p933_p10 = scmp.ne.s32.totalorder %s42_s28, %s932_s29  ;;  %p938_p12 = scmp.lt.s32.totalorder %s932_s29, %s932_s29 }
  0x1c   :  { %p939_p13 = por %p938_p12, %p937_p11 }
  0x1e   :  { %p940_p0 = pnand %p939_p13, %p933_p10 }
  0x20   :  { %943 = shalt.err (!%p940_p0)
}
  0x21   :  { %47 = dma.hbm_to_vmem [thread:$0]  %s1038_s2, 1024, %s42_s28, [#allocation7], %s972_s20, %s972_s20, %s973_s21  }
  0x22   :  { %964 = dma.done.wait [#allocation4], 1024  }
  0x23   :  { %965 = vsyncadd [#allocation4], 4294966272 }
  0x24   :  { %966 = dma.done.wait [#allocation7], 2048  }
  0x25   :  { %967 = vsyncadd [#allocation7], 4294965248  ;;  %v860_v0 = vld [vmem:[#allocation6 + $0x38] sm:$0xff]   ;;  %v861_v1 = vld [vmem:[#allocation6 + $0x30] sm:$0xff]  }
  0x26   :  { %788 = vmatprep.subr.bf16.mxu0 %v860_v0  ;;  %v862_v2 = vld [vmem:[#allocation6 + $0x28] sm:$0xff]   ;;  %v863_v3 = vld [vmem:[#allocation6 + $0x20] sm:$0xff]   ;;  %v864_v5 = vld [vmem:[#allocation6 + $0x18] sm:$0xff]  }
  0x27   :  { %789 = vmatpush3.bf16.msra.mxu0 %v860_v0  ;;  %v868_v4 = vld [vmem:[#allocation3] sm:$0xff]   ;;  %v865_v6 = vld [vmem:[#allocation6 + $0x10] sm:$0xff]   ;;  %v876_v7 = vld [vmem:[#allocation8 + $0x38] sm:$0xff]  }
  0x28   :  { %790 = vmatprep.subr.bf16.mxu0 %v861_v1  ;;  %804 = vmatprep.mubr.bf16.mxu0 %v868_v4  ;;  %v877_v8 = vld [vmem:[#allocation8 + $0x30] sm:$0xff]   ;;  %v866_v9 = vld [vmem:[#allocation6 + $0x8] sm:$0xff]   ;;  %v867_v11 = vld [vmem:[#allocation6] sm:$0xff]  }
  0x29   :  { %820 = vmatprep.subr.bf16.mxu1 %v876_v7  ;;  %v878_v10 = vld [vmem:[#allocation8 + $0x28] sm:$0xff]   ;;  %v879_v12 = vld [vmem:[#allocation8 + $0x20] sm:$0xff]   ;;  %v880_v13 = vld [vmem:[#allocation8 + $0x18] sm:$0xff]  }
  0x2a   :  { %821 = vmatpush3.bf16.msra.mxu1 %v876_v7  ;;  %v869_v14 = vld [vmem:[#allocation3 + $0x8] sm:$0xff]   ;;  %v870_v15 = vld [vmem:[#allocation3 + $0x10] sm:$0xff]   ;;  %v871_v16 = vld [vmem:[#allocation3 + $0x18] sm:$0xff]  }
  0x2b   :  { %791 = vmatpush3.bf16.msra.mxu0 %v861_v1  ;;  %822 = vmatprep.subr.bf16.mxu1 %v877_v8  ;;  %v872_v17 = vld [vmem:[#allocation3 + $0x20] sm:$0xff]   ;;  %v873_v18 = vld [vmem:[#allocation3 + $0x28] sm:$0xff]   ;;  %v874_v19 = vld [vmem:[#allocation3 + $0x30] sm:$0xff]  }
  0x2c   :  { %792 = vmatprep.subr.bf16.mxu0 %v862_v2  ;;  %v875_v20 = vld [vmem:[#allocation3 + $0x38] sm:$0xff]   ;;  %v881_v21 = vld [vmem:[#allocation8 + $0x10] sm:$0xff]   ;;  %v882_v22 = vld [vmem:[#allocation8 + $0x8] sm:$0xff]  }
  0x2d   :  { %v883_v23 = vld [vmem:[#allocation8] sm:$0xff]   ;;  %v749_v25 = vld [vmem:[#allocation6 + $0x8] sm:$0xff]   ;;  %v750_v38 = vld [vmem:[#allocation6 + $0x10] sm:$0xff]  }
  0x2e   :  { %823 = vmatpush3.bf16.msra.mxu1 %v877_v8  ;;  %v718_v24 = vld [vmem:[#allocation6] sm:$0xff]   ;;  %v724_v27 = vunpack.c.h.bf16 %v749_v25  ;;  %v723_v30 = vunpack.c.l.bf16 %v749_v25  ;;  %v751_v43 = vld [vmem:[#allocation6 + $0x18] sm:$0xff]   ;;  %v727_v46 = vunpack.c.l.bf16 %v750_v38  ;;  %v728_v48 = vunpack.c.h.bf16 %v750_v38 }
  0x2f   :  { %793 = vmatpush3.bf16.msra.mxu0 %v862_v2  ;;  %824 = vmatprep.subr.bf16.mxu1 %v878_v10  ;;  %v719_v28 = vunpack.c.l.bf16 %v718_v24  ;;  %v720_v29 = vunpack.c.h.bf16 %v718_v24  ;;  %v732_v47 = vunpack.c.h.bf16 %v751_v43  ;;  %v731_v52 = vunpack.c.l.bf16 %v751_v43  ;;  %v752_v62 = vld [vmem:[#allocation6 + $0x20] sm:$0xff]  }
  0x30   :  { %794 = vmatprep.subr.bf16.mxu0 %v863_v3  ;;  %v401_v33 = vmul.f32 0.1, %v724_v27  ;;  %v400_v39 = vmul.f32 0.1, %v723_v30  ;;  %v402_v55 = vmul.f32 0.1, %v727_v46  ;;  %v736_v8 = vunpack.c.h.bf16 %v752_v62 }
  0x31   :  { %v398_v34 = vmul.f32 0.1, %v719_v28  ;;  %v399_v35 = vmul.f32 0.1, %v720_v29  ;;  %v405_v57 = vmul.f32 0.1, %v732_v47 }
  0x32   :  { %825 = vmatpush3.bf16.msra.mxu1 %v878_v10  ;;  %v403_v58 = vmul.f32 0.1, %v728_v48  ;;  %v404_v63 = vmul.f32 0.1, %v731_v52  ;;  %v755_v27 = vld [vmem:[#allocation6 + $0x38] sm:$0xff]  }
  0x33   :  { %795 = vmatpush3.bf16.msra.mxu0 %v863_v3  ;;  %826 = vmatprep.subr.bf16.mxu1 %v879_v12  ;;  %v753_v3 = vld [vmem:[#allocation6 + $0x28] sm:$0xff]  }
  0x34   :  { %796 = vmatprep.subr.bf16.mxu0 %v864_v5  ;;  %v740_v7 = vunpack.c.h.bf16 %v753_v3 }
  0x36   :  { %827 = vmatpush3.bf16.msra.mxu1 %v879_v12  ;;  %v739_v12 = vunpack.c.l.bf16 %v753_v3 }
  0x37   :  { %797 = vmatpush3.bf16.msra.mxu0 %v864_v5  ;;  %828 = vmatprep.subr.bf16.mxu1 %v880_v13 }
  0x38   :  { %798 = vmatprep.subr.bf16.mxu0 %v865_v6 }
  0x3a   :  { %829 = vmatpush3.bf16.msra.mxu1 %v880_v13 }
  0x3b   :  { %799 = vmatpush3.bf16.msra.mxu0 %v865_v6  ;;  %830 = vmatprep.subr.bf16.mxu1 %v881_v21  ;;  %v735_v6 = vunpack.c.l.bf16 %v752_v62 }
  0x3c   :  { %800 = vmatprep.subr.bf16.mxu0 %v866_v9 }
  0x3e   :  { %831 = vmatpush3.bf16.msra.mxu1 %v881_v21 }
  0x3f   :  { %801 = vmatpush3.bf16.msra.mxu0 %v866_v9  ;;  %832 = vmatprep.subr.bf16.mxu1 %v882_v22 }
  0x40   :  { %802 = vmatprep.subr.bf16.mxu0 %v867_v11 }
  0x42   :  { %833 = vmatpush3.bf16.msra.mxu1 %v882_v22  ;;  %v754_v22 = vld [vmem:[#allocation6 + $0x30] sm:$0xff]  }
  0x43   :  { %803 = vmatpush3.bf16.msra.mxu0 %v867_v11  ;;  %834 = vmatprep.subr.bf16.mxu1 %v883_v23  ;;  %v743_v30 = vunpack.c.l.bf16 %v754_v22 }
  0x46   :  { %805 = vmatmul.mubr.bf16.vlgmr.msra.gmra.mxu0 %v869_v14  ;;  %835 = vmatpush3.bf16.msra.mxu1 %v883_v23  ;;  %v408_v23 = vmul.f32 0.1, %v739_v12 }
  0x47   :  { %808 = vmatprep.mubr.bf16.mxu0 %v870_v15  ;;  %v406_v15 = vmul.f32 0.1, %v735_v6 }
  0x4e   :  { %809 = vmatmul.mubr.bf16.gmra.mxu0 %v871_v16 }
  0x4f   :  { %812 = vmatprep.mubr.bf16.mxu0 %v872_v17  ;;  %v409_v17 = vmul.f32 0.1, %v740_v7 }
  0x56   :  { %813 = vmatmul.mubr.bf16.gmra.mxu0 %v873_v18  ;;  %v407_v18 = vmul.f32 0.1, %v736_v8 }
  0x57   :  { %816 = vmatprep.mubr.bf16.mxu0 %v874_v19 }
  0x5e   :  { %817 = vmatmul.mubr.bf16.gmra.mxu0 %v875_v20 }
 0x106   :  { %v806_v26 = vpop.f32.mrf.mxu0 }
 0x107   :  { %v432_v40 = vmul.f32 0.9, %v806_v26 }
 0x108   :  { %v263_v31 = vpop.f32.mrf.mxu0 }
 0x109   :  { %v430_v36 = vmul.f32 0.9, %v263_v31  ;;  %v448_v51 = vadd.f32 %v432_v40, %v400_v39  ;;  %v748_v31 = vunpack.c.h.bf16 %v755_v27  ;;  %v410_v39 = vmul.f32 0.1, %v743_v30 }
 0x10a   :  { %v807_v32 = vpop.f32.mrf.mxu0 }
 0x10b   :  { %v433_v37 = vmul.f32 0.9, %v807_v32  ;;  %v446_v49 = vadd.f32 %v430_v36, %v398_v34  ;;  %v744_v34 = vunpack.c.h.bf16 %v754_v22  ;;  %v747_v36 = vunpack.c.l.bf16 %v755_v27 }
 0x10c   :  { %v266_v41 = vpop.f32.mrf.mxu0 }
 0x10d   :  { %v431_v42 = vmul.f32 0.9, %v266_v41  ;;  %v449_v44 = vadd.f32 %v433_v37, %v401_v33  ;;  %v413_v41 = vmul.f32 0.1, %v748_v31  ;;  %v412_v46 = vmul.f32 0.1, %v747_v36 }
 0x10e   :  { %v810_v45 = vpop.f32.mrf.mxu0 }
 0x10f   :  { %v447_v50 = vadd.f32 %v431_v42, %v399_v35  ;;  %v463_v59 = vpack.c.bf16 %v449_v44, %v448_v51  ;;  %v436_v0 = vmul.f32 0.9, %v810_v45  ;;  %v411_v45 = vmul.f32 0.1, %v744_v34 }
 0x110   :  { %v279_v53 = vpop.f32.mrf.mxu0 }
 0x111   :  { %v462_v54 = vpack.c.bf16 %v447_v50, %v446_v49  ;;  %v434_v60 = vmul.f32 0.9, %v279_v53  ;;  %v452_v11 = vadd.f32 %v436_v0, %v404_v63 }
 0x112   :  { %v811_v56 = vpop.f32.mrf.mxu0 }
 0x113   :  { %v437_v61 = vmul.f32 0.9, %v811_v56  ;;  %836 = vmatprep.mubr.bf16.mxu1 %v462_v54  ;;  %v450_v9 = vadd.f32 %v434_v60, %v402_v55  ;;  %v1015_v56 = vld [vmem:[%s1039_s3] ss:$0 sm:$0xff]  ;;  %s975_s3 = smov [#allocation9]  }
 0x114   :  { %v282_v1 = vpop.f32.mrf.mxu0  ;;  %837 = vmatmul.mubr.bf16.vlgmr.msra.gmra.mxu1 %v463_v59  ;;  %s675_s5 = sshll.u32 %s975_s3, 4  ;;  %s676_s5 = int_to_ptr.vmem [resolvable:$true] %s675_s5 }
 0x115   :  { %v435_v2 = vmul.f32 0.9, %v282_v1  ;;  %v453_v4 = vadd.f32 %v437_v61, %v405_v57  ;;  %s944_s6 = scalar_lea.vmem %s676_s5, 2048  ;;  %p949_p2 = scmp.lt.s32.totalorder %s676_s5, %s676_s5 }
 0x116   :  { %v814_v5 = vpop.f32.mrf.mxu0  ;;  %p945_p1 = scmp.ne.s32.totalorder %s676_s5, %s944_s6  ;;  %p950_p3 = scmp.lt.s32.totalorder %s944_s6, %s944_s6 }
 0x117   :  { %v451_v10 = vadd.f32 %v435_v2, %v403_v58  ;;  %v465_v19 = vpack.c.bf16 %v453_v4, %v452_v11  ;;  %v440_v24 = vmul.f32 0.9, %v814_v5 }
 0x118   :  { %v295_v13 = vpop.f32.mrf.mxu0  ;;  %p951_p4 = por %p950_p3, %p949_p2 }
 0x119   :  { %v464_v14 = vpack.c.bf16 %v451_v10, %v450_v9  ;;  %v438_v20 = vmul.f32 0.9, %v295_v13  ;;  %v456_v35 = vadd.f32 %v440_v24, %v408_v23 }
 0x11a   :  { %v815_v16 = vpop.f32.mrf.mxu0  ;;  %p952_p5 = pnand %p951_p4, %p945_p1 }
 0x11b   :  { %v441_v21 = vmul.f32 0.9, %v815_v16  ;;  %840 = vmatprep.mubr.bf16.mxu1 %v464_v14  ;;  %v454_v32 = vadd.f32 %v438_v20, %v406_v15 }
 0x11c   :  { %v298_v25 = vpop.f32.mrf.mxu0  ;;  %841 = vmatmul.mubr.bf16.gmra.mxu1 %v465_v19 }
 0x11d   :  { %v439_v26 = vmul.f32 0.9, %v298_v25  ;;  %v457_v28 = vadd.f32 %v441_v21, %v409_v17 }
 0x11e   :  { %v818_v29 = vpop.f32.mrf.mxu0 }
 0x11f   :  { %v455_v33 = vadd.f32 %v439_v26, %v407_v18  ;;  %v467_v42 = vpack.c.bf16 %v457_v28, %v456_v35  ;;  %v444_v47 = vmul.f32 0.9, %v818_v29 }
 0x120   :  { %v311_v37 = vpop.f32.mrf.mxu0 }
 0x121   :  { %v466_v38 = vpack.c.bf16 %v455_v33, %v454_v32  ;;  %v442_v43 = vmul.f32 0.9, %v311_v37  ;;  %v460_v53 = vadd.f32 %v444_v47, %v412_v46 }
 0x122   :  { %v819_v40 = vpop.f32.mrf.mxu0 }
 0x123   :  { %v445_v44 = vmul.f32 0.9, %v819_v40  ;;  %844 = vmatprep.mubr.bf16.mxu1 %v466_v38  ;;  %v458_v51 = vadd.f32 %v442_v43, %v410_v39 }
 0x124   :  { %v314_v48 = vpop.f32.mrf.mxu0  ;;  %845 = vmatmul.mubr.bf16.gmra.mxu1 %v467_v42 }
 0x125   :  { %v443_v49 = vmul.f32 0.9, %v314_v48  ;;  %v461_v50 = vadd.f32 %v445_v44, %v413_v41 }
 0x127   :  { %v459_v52 = vadd.f32 %v443_v49, %v411_v45  ;;  %v469_v55 = vpack.c.bf16 %v461_v50, %v460_v53 }
 0x129   :  { %v468_v54 = vpack.c.bf16 %v459_v52, %v458_v51 }
 0x12b   :  { %848 = vmatprep.mubr.bf16.mxu1 %v468_v54 }
 0x12c   :  { %849 = vmatmul.mubr.bf16.gmra.mxu1 %v469_v55 }
 0x1d4   :  { %v838_v57 = vpop.f32.mrf.mxu1 }
 0x1d5   :  { %v584_v58 = vadd.f32 %v838_v57, %v1015_v56 }
 0x1d6   :  { %v575_v59 = vpop.f32.mrf.mxu1 }
 0x1d7   :  { %v640_v60 = vmax.f32 %v584_v58, 0.0  ;;  %v576_v61 = vadd.f32 %v1015_v56, %v575_v59 }
 0x1d8   :  { %v839_v62 = vpop.f32.mrf.mxu1 }
 0x1d9   :  { %656 = vst [vmem:[#allocation9 + $0x10] sm:$0xff] %v640_v60  ;;  %v638_v63 = vmax.f32 %v576_v61, 0.0  ;;  %v587_v0 = vadd.f32 %v839_v62, %v1015_v56 }
 0x1da   :  { %v578_v1 = vpop.f32.mrf.mxu1 }
 0x1db   :  { %654 = vst [vmem:[#allocation9] sm:$0xff] %v638_v63  ;;  %v641_v2 = vmax.f32 %v587_v0, 0.0  ;;  %v579_v3 = vadd.f32 %v1015_v56, %v578_v1 }
 0x1dc   :  { %v842_v4 = vpop.f32.mrf.mxu1 }
 0x1dd   :  { %657 = vst [vmem:[#allocation9 + $0x18] sm:$0xff] %v641_v2  ;;  %v639_v5 = vmax.f32 %v579_v3, 0.0  ;;  %v600_v6 = vadd.f32 %v842_v4, %v1015_v56 }
 0x1de   :  { %v591_v7 = vpop.f32.mrf.mxu1 }
 0x1df   :  { %655 = vst [vmem:[#allocation9 + $0x8] sm:$0xff] %v639_v5  ;;  %v644_v8 = vmax.f32 %v600_v6, 0.0  ;;  %v592_v9 = vadd.f32 %v1015_v56, %v591_v7 }
 0x1e0   :  { %v843_v10 = vpop.f32.mrf.mxu1 }
 0x1e1   :  { %660 = vst [vmem:[#allocation9 + $0x30] sm:$0xff] %v644_v8  ;;  %v642_v11 = vmax.f32 %v592_v9, 0.0  ;;  %v603_v12 = vadd.f32 %v843_v10, %v1015_v56 }
 0x1e2   :  { %v594_v13 = vpop.f32.mrf.mxu1 }
 0x1e3   :  { %658 = vst [vmem:[#allocation9 + $0x20] sm:$0xff] %v642_v11  ;;  %v645_v14 = vmax.f32 %v603_v12, 0.0  ;;  %v595_v15 = vadd.f32 %v1015_v56, %v594_v13 }
 0x1e4   :  { %v846_v16 = vpop.f32.mrf.mxu1 }
 0x1e5   :  { %661 = vst [vmem:[#allocation9 + $0x38] sm:$0xff] %v645_v14  ;;  %v643_v17 = vmax.f32 %v595_v15, 0.0  ;;  %v616_v18 = vadd.f32 %v846_v16, %v1015_v56 }
 0x1e6   :  { %v607_v19 = vpop.f32.mrf.mxu1 }
 0x1e7   :  { %659 = vst [vmem:[#allocation9 + $0x28] sm:$0xff] %v643_v17  ;;  %v648_v20 = vmax.f32 %v616_v18, 0.0  ;;  %v608_v21 = vadd.f32 %v1015_v56, %v607_v19 }
 0x1e8   :  { %v847_v22 = vpop.f32.mrf.mxu1 }
 0x1e9   :  { %664 = vst [vmem:[#allocation9 + $0x50] sm:$0xff] %v648_v20  ;;  %v646_v23 = vmax.f32 %v608_v21, 0.0  ;;  %v619_v24 = vadd.f32 %v847_v22, %v1015_v56 }
 0x1ea   :  { %v610_v25 = vpop.f32.mrf.mxu1 }
 0x1eb   :  { %662 = vst [vmem:[#allocation9 + $0x40] sm:$0xff] %v646_v23  ;;  %v649_v26 = vmax.f32 %v619_v24, 0.0  ;;  %v611_v27 = vadd.f32 %v1015_v56, %v610_v25 }
 0x1ec   :  { %v850_v28 = vpop.f32.mrf.mxu1 }
 0x1ed   :  { %665 = vst [vmem:[#allocation9 + $0x58] sm:$0xff] %v649_v26  ;;  %v647_v29 = vmax.f32 %v611_v27, 0.0  ;;  %v632_v30 = vadd.f32 %v850_v28, %v1015_v56 }
 0x1ee   :  { %v623_v31 = vpop.f32.mrf.mxu1 }
 0x1ef   :  { %663 = vst [vmem:[#allocation9 + $0x48] sm:$0xff] %v647_v29  ;;  %v652_v32 = vmax.f32 %v632_v30, 0.0  ;;  %v624_v33 = vadd.f32 %v1015_v56, %v623_v31 }
 0x1f0   :  { %v851_v34 = vpop.f32.mrf.mxu1 }
 0x1f1   :  { %668 = vst [vmem:[#allocation9 + $0x70] sm:$0xff] %v652_v32  ;;  %v650_v35 = vmax.f32 %v624_v33, 0.0  ;;  %v635_v36 = vadd.f32 %v851_v34, %v1015_v56 }
 0x1f2   :  { %v626_v37 = vpop.f32.mrf.mxu1 }
 0x1f3   :  { %666 = vst [vmem:[#allocation9 + $0x60] sm:$0xff] %v650_v35  ;;  %v653_v38 = vmax.f32 %v635_v36, 0.0  ;;  %v627_v39 = vadd.f32 %v1015_v56, %v626_v37 }
 0x1f5   :  { %669 = vst [vmem:[#allocation9 + $0x78] sm:$0xff] %v653_v38  ;;  %v651_v40 = vmax.f32 %v627_v39, 0.0 }
 0x1f7   :  { %667 = vst [vmem:[#allocation9 + $0x68] sm:$0xff] %v651_v40 }
 0x1f8   :  { %955 = shalt.err (!%p952_p5)
}
 0x1f9   :  { %s976_s7 = smov 128   ;;  %s977_s8 = smov 8  }
 0x1fa   :  { %681 = dma.vmem_to_hbm [thread:$0]  %s676_s5, 2048, %s1040_s4, [#allocation5], %s976_s7, %s976_s7, %s977_s8  }
 0x1fb   :  { %968 = dma.done.wait [#allocation5], 2048  }
 0x1fc   :  { %969 = vsyncadd [#allocation5], 4294965248 }
 0x1fd   :  { %685 = vsyncpa [#allocation4], 1 }
 0x1fe   :  { %686 = vsyncpa [#allocation7], 1 }
 0x1ff   :  { %687 = vsyncpa [#allocation5], 1 }

</bundles_post_ra>
